<compile_context>
chip_gen: v6e
topology: v6e:2x2x1
jax: 0.10.0
libtpu: 0.0.40
codegen_flags: <defaults>
</compile_context>

<pallas_src>
import jax
import jax.numpy as jnp
from jax import lax
from jax.experimental import pallas as pl
from jax.experimental.pallas import tpu as pltpu


def _round_up(x, m):
    return (x + m - 1) // m * m


_VMEM_LIMIT_CACHE = None


def _vmem_limit():
    """Scoped-VMEM budget derived from the chip (~3/4 cap, clamped 32..64 MiB)."""
    global _VMEM_LIMIT_CACHE
    if _VMEM_LIMIT_CACHE is None:
        try:
            cap = int(pltpu.get_tpu_info().vmem_capacity_bytes)
        except Exception:
            cap = 128 * 1024 * 1024
        _VMEM_LIMIT_CACHE = min(64 * 1024 * 1024,
                                max(32 * 1024 * 1024, (cap * 3) // 4))
    return _VMEM_LIMIT_CACHE


# ----------------------------------------------------------------------------
# Generic tiled  (M, K) @ (K, N) + b  kernel: bf16 MXU operands, f32 accumulate.
# Used for (a) the per-layer whole-sequence LSTM input projections and
# (b) the final vocab projection.
# ----------------------------------------------------------------------------
def _matmul_bias_kernel(x_ref, w_ref, b_ref, o_ref):
    x = x_ref[...].astype(jnp.bfloat16)
    o_ref[...] = (
        jnp.dot(x, w_ref[...], preferred_element_type=jnp.float32) + b_ref[...]
    )


def matmul_bias(x, w_bf16, b, *, tm=256, tn=512):
    """x: (M, K) bf16/f32, w_bf16: (K, N) bf16, b: (1, N) f32 -> (M, N) f32."""
    M, K = x.shape
    N = w_bf16.shape[1]

    tn = min(tn, _round_up(N, 128))
    Np = _round_up(N, tn)
    tm = min(tm, _round_up(M, 8))
    Mp = _round_up(M, tm)
    if Mp != M:
        x = jnp.pad(x, ((0, Mp - M), (0, 0)))        # zero rows, sliced off
    if Np != N:
        w_bf16 = jnp.pad(w_bf16, ((0, 0), (0, Np - N)))
        b = jnp.pad(b, ((0, 0), (0, Np - N)))

    out = pl.pallas_call(
        _matmul_bias_kernel,
        out_shape=jax.ShapeDtypeStruct((Mp, Np), jnp.float32),
        grid=(Mp // tm, Np // tn),
        in_specs=[
            pl.BlockSpec((tm, K), lambda i, j: (i, 0)),
            pl.BlockSpec((K, tn), lambda i, j: (0, j)),
            pl.BlockSpec((1, tn), lambda i, j: (0, j)),
        ],
        out_specs=pl.BlockSpec((tm, tn), lambda i, j: (i, j)),
        compiler_params=pltpu.CompilerParams(
            dimension_semantics=("parallel", "parallel"),
            vmem_limit_bytes=_vmem_limit(),
        ),
    )(x, w_bf16, b)
    if Mp != M or Np != N:
        out = out[:M, :N]
    return out


# ----------------------------------------------------------------------------
# LSTM recurrence kernel (one pallas_call per layer), tiled over time chunks.
# xproj = x_t @ W_ih^T + (b_ih + b_hh) is precomputed for the whole sequence;
# per step only gates = xproj[t] + h_{t-1} @ W_hh^T and the gate math run.
# Gate column order inside the kernel is (i, f, o, g) (reordered host-side)
# so the three sigmoids operate on one contiguous (B, 3H) slab.
# ----------------------------------------------------------------------------
def _lstm_recurrence_kernel(xproj_ref, w_hh_ref, out_ref, h_ref, c_ref):
    Tc, Bc, four_h = xproj_ref.shape
    H = four_h // 4

    @pl.when(pl.program_id(1) == 0)          # new batch chunk -> reset state
    def _():
        h_ref[...] = jnp.zeros_like(h_ref)
        c_ref[...] = jnp.zeros_like(c_ref)

    w_hh = w_hh_ref[...]                      # (H, 4H) bf16, hoisted

    # TODO(synk): hold W_hh in the MXU weight registers across the loop with
    # pltpu.matmul_push_rhs / matmul_acc_lhs / matmul_pop to avoid re-staging
    # the RHS every step (LHS is only Bc rows).
    def step(t, carry):
        h_prev, c_prev = carry
        gates = xproj_ref[t] + jnp.dot(
            h_prev.astype(jnp.bfloat16), w_hh,
            preferred_element_type=jnp.float32,
        )                                                       # (Bc, 4H) f32
        sig = jax.nn.sigmoid(gates[:, : 3 * H])                 # i | f | o
        g_g = jnp.tanh(gates[:, 3 * H:])
        i_g = sig[:, 0:H]
        f_g = sig[:, H:2 * H]
        o_g = sig[:, 2 * H:3 * H]
        c_new = f_g * c_prev + i_g * g_g
        h_new = o_g * jnp.tanh(c_new)
        out_ref[t] = h_new.astype(out_ref.dtype)
        return (h_new, c_new)

    h_fin, c_fin = lax.fori_loop(
        0, Tc, step, (h_ref[...], c_ref[...]), unroll=2)
    h_ref[...] = h_fin
    c_ref[...] = c_fin


def lstm_recurrence(xproj, w_hh_bf16, *, tc=8, bc=None):
    """xproj: (T, B, 4H) f32, w_hh_bf16: (H, 4H) bf16 -> (T, B, H) bf16.

    B must be a multiple of 8 (padded by the caller).  Set bc=B//2 to split
    the batch across the two v7x TensorCores (axis 0 is "parallel").
    """
    T, B, four_h = xproj.shape
    H = four_h // 4
    tc = min(tc, T)
    Tp = _round_up(T, tc)
    if Tp != T:
        xproj = jnp.pad(xproj, ((0, Tp - T), (0, 0), (0, 0)))
    if bc is None:
        bc = B                                 # single batch chunk by default
    nb, nt = B // bc, Tp // tc

    out = pl.pallas_call(
        _lstm_recurrence_kernel,
        out_shape=jax.ShapeDtypeStruct((Tp, B, H), jnp.bfloat16),
        grid=(nb, nt),
        in_specs=[
            pl.BlockSpec((tc, bc, four_h), lambda ib, it: (it, ib, 0)),
            pl.BlockSpec((H, four_h), lambda ib, it: (0, 0)),
        ],
        out_specs=pl.BlockSpec((tc, bc, H), lambda ib, it: (it, ib, 0)),
        scratch_shapes=[
            pltpu.VMEM((bc, H), jnp.float32),   # h carry
            pltpu.VMEM((bc, H), jnp.float32),   # c carry
        ],
        compiler_params=pltpu.CompilerParams(
            dimension_semantics=("parallel", "arbitrary"),
            vmem_limit_bytes=_vmem_limit(),
        ),
    )(xproj, w_hh_bf16)
    return out[:T] if Tp != T else out


# ----------------------------------------------------------------------------
# Full DecoderRNN.forward
# ----------------------------------------------------------------------------
def decoder_rnn_forward(features, captions, lengths, params,
                        hidden_size, num_layers):
    """
    features: (B, embed_size) float32
    captions: (B, L) int32
    lengths : Python list of ints, sorted descending, each <= L + 1
    params  : (embed_w, [(w_ih_T bf16, w_hh_T bf16, bias f32)...],  # (i,f,o,g)
               lin_w_T bf16, lin_b f32)
    Returns : (sum(lengths), vocab_size) float32 — same semantics as
              linear(pack_padded_sequence(lstm(...)).data)
    """
    embed_w, lstm_params, lin_w_t, lin_b = params
    B = features.shape[0]
    H = hidden_size

    # Embedding lookup + concat image features as timestep 0 (plain-JAX glue).
    embeddings = jnp.take(embed_w, captions, axis=0)                # (B, L, E)
    embeddings = jnp.concatenate([features[:, None, :], embeddings], axis=1)
    T = embeddings.shape[1]                                         # L + 1

    # Time-major, bf16 activation slab, batch padded to a sublane multiple.
    B_pad = _round_up(B, 8)
    x = jnp.transpose(embeddings, (1, 0, 2)).astype(jnp.bfloat16)   # (T, B, E)
    if B_pad != B:
        x = jnp.pad(x, ((0, 0), (0, B_pad - B), (0, 0)))

    for (w_ih_t, w_hh_t, bias) in lstm_params:
        in_dim = w_ih_t.shape[0]
        # (1) whole-sequence input projection: one big MXU matmul, bias folded.
        xproj = matmul_bias(x.reshape(T * B_pad, in_dim), w_ih_t, bias)
        xproj = xproj.reshape(T, B_pad, 4 * H)
        # (2) serial recurrence kernel (time-chunked, h/c in VMEM scratch).
        x = lstm_recurrence(xproj, w_hh_t)                   # (T, B_pad, H) bf16

    hiddens = x                                              # (T, B_pad, H) bf16

    # pack_padded_sequence(batch_first=True).data ordering: time-major over
    # batch entries still valid at each timestep (lengths sorted descending).
    # TODO(synk): fuse this gather into the vocab projection via scalar-
    # prefetched row indices to save one HBM pass over the hidden states.
    flat_idx = [t * B_pad + b for t in range(T) for b in range(B)
                if lengths[b] > t]
    packed = hiddens.reshape(T * B_pad, H)[jnp.array(flat_idx, jnp.int32)]

    return matmul_bias(packed, lin_w_t, lin_b)               # (N, V) f32


# ----------------------------------------------------------------------------
# Host-side weight prep helpers
# ----------------------------------------------------------------------------
def _reorder_gate_cols(a, H):
    """Last-dim 4H blocks in PyTorch order (i,f,g,o) -> kernel order (i,f,o,g)."""
    return jnp.concatenate(
        [a[..., 0:H], a[..., H:2 * H], a[..., 3 * H:4 * H], a[..., 2 * H:3 * H]],
        axis=-1)


# ----------------------------------------------------------------------------
# Pure-JAX reference (f32, PyTorch layout) for a correctness sanity check.
# ----------------------------------------------------------------------------
def _reference_forward(features, captions, lengths, embed_w, lstm_raw,
                       lin_w, lin_b):
    emb = jnp.take(embed_w, captions, axis=0)
    emb = jnp.concatenate([features[:, None, :], emb], axis=1)       # (B, T, E)
    B, T, _ = emb.shape
    H = lstm_raw[0][1].shape[1]
    x = emb
    for (w_ih, w_hh, b_ih, b_hh) in lstm_raw:
        h = jnp.zeros((B, H), jnp.float32)
        c = jnp.zeros((B, H), jnp.float32)
        outs = []
        for t in range(T):
            g = x[:, t, :] @ w_ih.T + b_ih + h @ w_hh.T + b_hh
            i = jax.nn.sigmoid(g[:, :H])
            f = jax.nn.sigmoid(g[:, H:2 * H])
            gg = jnp.tanh(g[:, 2 * H:3 * H])
            o = jax.nn.sigmoid(g[:, 3 * H:])
            c = f * c + i * gg
            h = o * jnp.tanh(c)
            outs.append(h)
        x = jnp.stack(outs, axis=1)                                  # (B, T, H)
    rows = [x[b, t] for t in range(T) for b in range(B) if lengths[b] > t]
    packed = jnp.stack(rows, axis=0)
    return packed @ lin_w.T + lin_b


if __name__ == "__main__":
    # Small but lane-aligned shapes (H/E/V multiples of 128).
    embed_size, hidden_size, vocab_size, num_layers = 128, 128, 256, 2
    B, cap_len = 2, 7
    T = cap_len + 1
    lengths = [8, 6]  # sorted descending, <= T

    key = jax.random.PRNGKey(0)
    keys = jax.random.split(key, 16)

    embed_w = jax.random.normal(keys[0], (vocab_size, embed_size),
                                jnp.float32) * 0.1

    lstm_params, lstm_raw = [], []
    k = 1
    for l in range(num_layers):
        in_size = embed_size if l == 0 else hidden_size
        w_ih = jax.random.normal(keys[k], (4 * hidden_size, in_size),
                                 jnp.float32) * 0.1; k += 1
        w_hh = jax.random.normal(keys[k], (4 * hidden_size, hidden_size),
                                 jnp.float32) * 0.1; k += 1
        b_ih = jax.random.normal(keys[k], (4 * hidden_size,),
                                 jnp.float32) * 0.1; k += 1
        b_hh = jax.random.normal(keys[k], (4 * hidden_size,),
                                 jnp.float32) * 0.1; k += 1
        lstm_raw.append((w_ih, w_hh, b_ih, b_hh))
        # Kernel-side layout: pre-transposed bf16 weights, folded f32 bias,
        # gate columns reordered (i, f, g, o) -> (i, f, o, g).
        lstm_params.append((
            _reorder_gate_cols(w_ih.T, hidden_size).astype(jnp.bfloat16),
            _reorder_gate_cols(w_hh.T, hidden_size).astype(jnp.bfloat16),
            _reorder_gate_cols((b_ih + b_hh).reshape(1, -1), hidden_size),
        ))

    lin_w = jax.random.normal(keys[k], (vocab_size, hidden_size),
                              jnp.float32) * 0.1; k += 1
    lin_b = jax.random.normal(keys[k], (vocab_size,), jnp.float32) * 0.1; k += 1

    features = jax.random.normal(keys[k], (B, embed_size), jnp.float32); k += 1
    captions = jax.random.randint(keys[k], (B, cap_len), 0, vocab_size,
                                  dtype=jnp.int32)

    params = (embed_w, lstm_params,
              lin_w.T.astype(jnp.bfloat16), lin_b.reshape(1, -1))

    outputs = decoder_rnn_forward(features, captions, lengths, params,
                                  hidden_size, num_layers)
    jax.block_until_ready(outputs)

    assert outputs.shape == (sum(lengths), vocab_size)
    assert outputs.dtype == jnp.float32

    ref = _reference_forward(features, captions, lengths, embed_w, lstm_raw,
                             lin_w, lin_b)
    err = jnp.max(jnp.abs(outputs - ref))
    assert float(err) < 5e-2, f"max abs error {float(err)}"

    print("KERNEL_OK")
</pallas_src>

<mosaic_0001>
module attributes {stable_mosaic.version = 11 : i64} {
  func.func @_matmul_bias_kernel(%arg0: i32, %arg1: i32, %arg2: memref<64x128xbf16, #tpu.memory_space<vmem>>, %arg3: memref<128x512xbf16, #tpu.memory_space<vmem>>, %arg4: memref<1x512xf32, #tpu.memory_space<vmem>>, %arg5: memref<64x512xf32, #tpu.memory_space<vmem>>) attributes {dimension_semantics = [#tpu.dimension_semantics<parallel>, #tpu.dimension_semantics<parallel>], iteration_bounds = array<i64: 1, 1>, scalar_prefetch = 0 : i64, scratch_operands = 0 : i64, tpu.core_type = #tpu.core_type<tc>, window_params = [{transform_indices = @transform_0, window_bounds = array<i64: 64, 128>}, {transform_indices = @transform_1, window_bounds = array<i64: 128, 512>}, {transform_indices = @transform_2, window_bounds = array<i64: 1, 512>}, {transform_indices = @transform_3, window_bounds = array<i64: 64, 512>}]} {
    %c0 = arith.constant 0 : index
    %c0_0 = arith.constant 0 : index
    %0 = vector.load %arg2[%c0, %c0_0] : memref<64x128xbf16, #tpu.memory_space<vmem>>, vector<64x128xbf16>
    %c0_1 = arith.constant 0 : index
    %c0_2 = arith.constant 0 : index
    %1 = vector.load %arg3[%c0_1, %c0_2] : memref<128x512xbf16, #tpu.memory_space<vmem>>, vector<128x512xbf16>
    %cst = arith.constant dense<0.000000e+00> : vector<64x512xf32>
    %2 = tpu.matmul %0, %1, %cst {dimension_numbers = #tpu.dot_dimension_numbers<[1], [0], [0], [1], [0, 0, 1, 1], [], []>} : vector<64x128xbf16>, vector<128x512xbf16>, vector<64x512xf32> -> vector<64x512xf32>
    %c0_3 = arith.constant 0 : index
    %c0_4 = arith.constant 0 : index
    %3 = vector.load %arg4[%c0_3, %c0_4] : memref<1x512xf32, #tpu.memory_space<vmem>>, vector<1x512xf32>
    %4 = vector.broadcast %3 : vector<1x512xf32> to vector<64x512xf32>
    %5 = arith.addf %2, %4 : vector<64x512xf32>
    %c0_5 = arith.constant 0 : index
    %c0_6 = arith.constant 0 : index
    %6 = vector.load %arg5[%c0_5, %c0_6] : memref<64x512xf32, #tpu.memory_space<vmem>>, vector<64x512xf32>
    tpu.vector_store %arg5[%c0_5, %c0_6], %5 {strides = array<i32>} : memref<64x512xf32, #tpu.memory_space<vmem>>, vector<64x512xf32>,
    return
  }
  func.func @transform_0(%arg0: i32, %arg1: i32) -> (i32, i32) {
    %c0_i32 = arith.constant 0 : i32
    %c0_i32_0 = arith.constant 0 : i32
    return %arg0, %c0_i32 : i32, i32
  }
  func.func @transform_1(%arg0: i32, %arg1: i32) -> (i32, i32) {
    %c0_i32 = arith.constant 0 : i32
    %c0_i32_0 = arith.constant 0 : i32
    return %c0_i32, %arg1 : i32, i32
  }
  func.func @transform_2(%arg0: i32, %arg1: i32) -> (i32, i32) {
    %c0_i32 = arith.constant 0 : i32
    %c0_i32_0 = arith.constant 0 : i32
    return %c0_i32, %arg1 : i32, i32
  }
  func.func @transform_3(%arg0: i32, %arg1: i32) -> (i32, i32) {
    %c0_i32 = arith.constant 0 : i32
    return %arg0, %arg1 : i32, i32
  }
}

</mosaic_0001>

<bundles_post_ra>
// kernel: tpu_custom_call.1
= control target key start
LH: loop header
LB: loop body
LE: loop exit
PB: predicated region body
PF: predicated region fallthrough
CT: control target
= control target key end

     0   :  { %8 = vsyncpa [#allocation3], 0  ;;  %s773_s0 = inlined_call_operand.hbm [shape: bf16[64,128], index: 0, kind: input, shape index: {}]   ;;  %s774_s1 = inlined_call_operand.hbm [shape: bf16[128,512], index: 1, kind: input, shape index: {}]   ;;  %s775_s2 = inlined_call_operand.hbm [shape: f32[1,512], index: 2, kind: input, shape index: {}]   ;;  %s776_s3 = inlined_call_operand.hbm [shape: f32[64,512], index: 3, kind: output, shape index: {}]  }
   0x1   :  { %9 = vsyncpa [#allocation6], 0 }
   0x2   :  { %10 = vsyncpa [#allocation4], 0  ;;  %s682_s12 = smov [#allocation5]  }
   0x3   :  { %s28_s13 = sshll.u32 %s682_s12, 4  ;;  %s29_s13 = int_to_ptr.vmem [resolvable:$true] %s28_s13 }
   0x4   :  { %s604_s14 = scalar_lea.vmem %s29_s13, 4096  ;;  %p609_p1 = scmp.lt.s32.totalorder %s29_s13, %s29_s13 }
   0x5   :  { %p605_p0 = scmp.ne.s32.totalorder %s29_s13, %s604_s14  ;;  %p610_p2 = scmp.lt.s32.totalorder %s604_s14, %s604_s14 }
   0x7   :  { %p611_p3 = por %p610_p2, %p609_p1 }
   0x9   :  { %p612_p4 = pnand %p611_p3, %p605_p0 }
   0xb   :  { %615 = shalt.err (!%p612_p4)
}
   0xc   :  { %s683_s15 = smov 256   ;;  %s684_s16 = smov 16  }
   0xd   :  { %34 = dma.hbm_to_vmem [thread:$0]  %s774_s1, 4096, %s29_s13, [#allocation6], %s683_s15, %s683_s15, %s684_s16  }
   0xe   :  { %s685_s19 = smov [#allocation2]  }
   0xf   :  { %s16_s20 = sshll.u32 %s685_s19, 4  ;;  %s17_s20 = int_to_ptr.vmem [resolvable:$true] %s16_s20 }
  0x10   :  { %s624_s21 = scalar_lea.vmem %s17_s20, 512  ;;  %p629_p6 = scmp.lt.s32.totalorder %s17_s20, %s17_s20 }
  0x11   :  { %p625_p5 = scmp.ne.s32.totalorder %s17_s20, %s624_s21  ;;  %p630_p7 = scmp.lt.s32.totalorder %s624_s21, %s624_s21 }
  0x13   :  { %p631_p8 = por %p630_p7, %p629_p6 }
  0x15   :  { %p632_p9 = pnand %p631_p8, %p625_p5 }
  0x17   :  { %635 = shalt.err (!%p632_p9)
}
  0x18   :  { %s686_s22 = smov 64   ;;  %s687_s23 = smov 4  }
  0x19   :  { %22 = dma.hbm_to_vmem [thread:$0]  %s773_s0, 512, %s17_s20, [#allocation3], %s686_s22, %s686_s22, %s687_s23  }
  0x1a   :  { %s688_s26 = smov [#allocation7]  }
  0x1b   :  { %s41_s27 = sshll.u32 %s688_s26, 4  ;;  %s42_s27 = int_to_ptr.vmem [resolvable:$true] %s41_s27 }
  0x1c   :  { %s644_s1 = scalar_lea.vmem %s42_s27, 64  ;;  %p649_p11 = scmp.lt.s32.totalorder %s42_s27, %s42_s27 }
  0x1d   :  { %p645_p10 = scmp.ne.s32.totalorder %s42_s27, %s644_s1  ;;  %p650_p12 = scmp.lt.s32.totalorder %s644_s1, %s644_s1 }
  0x1f   :  { %p651_p13 = por %p650_p12, %p649_p11 }
  0x21   :  { %p652_p0 = pnand %p651_p13, %p645_p10 }
  0x23   :  { %655 = shalt.err (!%p652_p0)
}
  0x24   :  { %44 = dma.hbm_to_vmem [thread:$0]  %s775_s2, 64, %s42_s27, [#allocation6]  }
  0x25   :  { %676 = dma.done.wait [#allocation3], 512  }
  0x26   :  { %677 = vsyncadd [#allocation3], 4294966784 }
  0x27   :  { %678 = dma.done.wait [#allocation6], 4160  }
  0x28   :  { %679 = vsyncadd [#allocation6], 4294963136  ;;  %v689_v0 = vmov 0   ;;  %v544_v1 = vld [vmem:[#allocation5 + $0xe4] ss:$16 sps:$4 sm:$0xff]   ;;  %v593_v34 = vld [vmem:[#allocation2 + $0x8] sm:$0xff]   ;;  %v97_v37 = vlaneseq }
  0x29   :  { %333 = vmatprep.mubr.bf16.mxu0 %v689_v0  ;;  %406 = vmatprep.mubr.bf16.mxu1 %v689_v0  ;;  %v546_v2 = vld [vmem:[#allocation5 + $0xec] ss:$16 sps:$4 sm:$0xff]   ;;  %v548_v3 = vld [vmem:[#allocation5 + $0xe0] ss:$16 sps:$4 sm:$0xff]   ;;  %v549_v4 = vld [vmem:[#allocation5 + $0xe8] ss:$16 sps:$4 sm:$0xff]  }
  0x2a   :  { %301 = vmatprep.subr.bf16.mxu0 %v544_v1  ;;  %374 = vmatprep.subr.bf16.mxu1 %v546_v2  ;;  %v550_v5 = vld [vmem:[#allocation5 + $0xc4] ss:$16 sps:$4 sm:$0xff]   ;;  %v552_v6 = vld [vmem:[#allocation5 + $0xcc] ss:$16 sps:$4 sm:$0xff]   ;;  %v554_v7 = vld [vmem:[#allocation5 + $0xc0] ss:$16 sps:$4 sm:$0xff]  }
  0x2b   :  { %302 = vmatpush1.bf16.msra.mxu0 %v548_v3  ;;  %375 = vmatpush1.bf16.msra.mxu1 %v549_v4  ;;  %v555_v8 = vld [vmem:[#allocation5 + $0xc8] ss:$16 sps:$4 sm:$0xff]   ;;  %v556_v9 = vld [vmem:[#allocation5 + $0xa4] ss:$16 sps:$4 sm:$0xff]   ;;  %v558_v10 = vld [vmem:[#allocation5 + $0xac] ss:$16 sps:$4 sm:$0xff]  }
  0x2c   :  { %303 = vmatprep.subr.bf16.mxu0 %v550_v5  ;;  %376 = vmatprep.subr.bf16.mxu1 %v552_v6  ;;  %v560_v11 = vld [vmem:[#allocation5 + $0xa0] ss:$16 sps:$4 sm:$0xff]   ;;  %v561_v12 = vld [vmem:[#allocation5 + $0xa8] ss:$16 sps:$4 sm:$0xff]   ;;  %v562_v13 = vld [vmem:[#allocation5 + $0x84] ss:$16 sps:$4 sm:$0xff]  }
  0x2d   :  { %v564_v14 = vld [vmem:[#allocation5 + $0x8c] ss:$16 sps:$4 sm:$0xff]   ;;  %v566_v15 = vld [vmem:[#allocation5 + $0x80] ss:$16 sps:$4 sm:$0xff]   ;;  %v567_v16 = vld [vmem:[#allocation5 + $0x88] ss:$16 sps:$4 sm:$0xff]  }
  0x2e   :  { %v568_v17 = vld [vmem:[#allocation5 + $0x64] ss:$16 sps:$4 sm:$0xff]   ;;  %v570_v18 = vld [vmem:[#allocation5 + $0x6c] ss:$16 sps:$4 sm:$0xff]   ;;  %v572_v19 = vld [vmem:[#allocation5 + $0x60] ss:$16 sps:$4 sm:$0xff]  }
  0x2f   :  { %304 = vmatpush1.bf16.msra.mxu0 %v554_v7  ;;  %377 = vmatpush1.bf16.msra.mxu1 %v555_v8  ;;  %v573_v20 = vld [vmem:[#allocation5 + $0x68] ss:$16 sps:$4 sm:$0xff]   ;;  %v574_v21 = vld [vmem:[#allocation5 + $0x44] ss:$16 sps:$4 sm:$0xff]   ;;  %v576_v22 = vld [vmem:[#allocation5 + $0x4c] ss:$16 sps:$4 sm:$0xff]  }
  0x30   :  { %305 = vmatprep.subr.bf16.mxu0 %v556_v9  ;;  %378 = vmatprep.subr.bf16.mxu1 %v558_v10  ;;  %v578_v23 = vld [vmem:[#allocation5 + $0x40] ss:$16 sps:$4 sm:$0xff]   ;;  %v579_v24 = vld [vmem:[#allocation5 + $0x48] ss:$16 sps:$4 sm:$0xff]   ;;  %v580_v25 = vld [vmem:[#allocation5 + $0x24] ss:$16 sps:$4 sm:$0xff]  }
  0x31   :  { %v582_v26 = vld [vmem:[#allocation5 + $0x2c] ss:$16 sps:$4 sm:$0xff]   ;;  %v584_v27 = vld [vmem:[#allocation5 + $0x20] ss:$16 sps:$4 sm:$0xff]   ;;  %v585_v28 = vld [vmem:[#allocation5 + $0x28] ss:$16 sps:$4 sm:$0xff]  }
  0x32   :  { %v586_v29 = vld [vmem:[#allocation5 + $0x4] ss:$16 sps:$4 sm:$0xff]   ;;  %v588_v30 = vld [vmem:[#allocation5 + $0xc] ss:$16 sps:$4 sm:$0xff]   ;;  %v590_v31 = vld [vmem:[#allocation5] ss:$16 sps:$4 sm:$0xff]  }
  0x33   :  { %306 = vmatpush1.bf16.msra.mxu0 %v560_v11  ;;  %379 = vmatpush1.bf16.msra.mxu1 %v561_v12  ;;  %v591_v32 = vld [vmem:[#allocation5 + $0x8] ss:$16 sps:$4 sm:$0xff]   ;;  %v592_v33 = vld [vmem:[#allocation2] sm:$0xff]   ;;  %v594_v35 = vld [vmem:[#allocation2 + $0x10] sm:$0xff]   ;;  %v98_v38 = vshrl.u32 %v97_v37, 7  ;;  %s690_s0 = smov [#allocation8]  }
  0x34   :  { %307 = vmatprep.subr.bf16.mxu0 %v562_v13  ;;  %380 = vmatprep.subr.bf16.mxu1 %v564_v14  ;;  %v595_v36 = vld [vmem:[#allocation2 + $0x18] sm:$0xff]   ;;  %v95_v41 = vld [vmem:[#allocation7] sm:$0xf]  ;;  %s484_s2 = sshll.u32 %s690_s0, 4  ;;  %s485_s2 = int_to_ptr.vmem [resolvable:$true] %s484_s2 }
  0x35   :  { %v99_v39 = vsub.s32 0, %v98_v38  ;;  %v107_v40 = vsub.s32 2, %v98_v38  ;;  %v103_v42 = vsub.s32 1, %v98_v38  ;;  %v111_v43 = vsub.s32 3, %v98_v38  ;;  %s656_s30 = scalar_lea.vmem %s485_s2, 4096  ;;  %p661_p2 = scmp.lt.s32.totalorder %s485_s2, %s485_s2 }
  0x36   :  { %p657_p1 = scmp.ne.s32.totalorder %s485_s2, %s656_s30  ;;  %p662_p3 = scmp.lt.s32.totalorder %s656_s30, %s656_s30 }
  0x37   :  { %308 = vmatpush1.bf16.msra.mxu0 %v566_v15  ;;  %381 = vmatpush1.bf16.msra.mxu1 %v567_v16  ;;  %v730_v44 = vrot.slane %v95_v41, %v99_v39  ;;  %v732_v45 = vrot.slane %v95_v41, %v107_v40  ;;  %v734_v46 = vrot.slane %v95_v41, %v103_v42 }
  0x38   :  { %309 = vmatprep.subr.bf16.mxu0 %v568_v17  ;;  %382 = vmatprep.subr.bf16.mxu1 %v570_v18  ;;  %v736_v47 = vrot.slane %v95_v41, %v111_v43  ;;  %p663_p4 = por %p662_p3, %p661_p2 }
  0x3a   :  { %p664_p5 = pnand %p663_p4, %p657_p1 }
  0x3b   :  { %310 = vmatpush1.bf16.msra.mxu0 %v572_v19  ;;  %383 = vmatpush1.bf16.msra.mxu1 %v573_v20 }
  0x3c   :  { %311 = vmatprep.subr.bf16.mxu0 %v574_v21  ;;  %384 = vmatprep.subr.bf16.mxu1 %v576_v22 }
  0x3f   :  { %312 = vmatpush1.bf16.msra.mxu0 %v578_v23  ;;  %385 = vmatpush1.bf16.msra.mxu1 %v579_v24 }
  0x40   :  { %313 = vmatprep.subr.bf16.mxu0 %v580_v25  ;;  %386 = vmatprep.subr.bf16.mxu1 %v582_v26 }
  0x43   :  { %314 = vmatpush1.bf16.msra.mxu0 %v584_v27  ;;  %387 = vmatpush1.bf16.msra.mxu1 %v585_v28 }
  0x44   :  { %315 = vmatprep.subr.bf16.mxu0 %v586_v29  ;;  %388 = vmatprep.subr.bf16.mxu1 %v588_v30 }
  0x47   :  { %316 = vmatpush1.bf16.msra.mxu0 %v590_v31  ;;  %389 = vmatpush1.bf16.msra.mxu1 %v591_v32 }
  0x4a   :  { %334 = vmatmul.mubr.bf16.vlgmr.msra.gmra.mxu0 %v592_v33  ;;  %407 = vmatmul.mubr.bf16.vlgmr.msra.gmra.mxu1 %v592_v33 }
  0x4b   :  { %343 = vmatprep.mubr.bf16.mxu0 %v689_v0  ;;  %416 = vmatprep.mubr.bf16.mxu1 %v689_v0 }
  0x52   :  { %344 = vmatmul.mubr.bf16.gmra.mxu0 %v593_v34  ;;  %417 = vmatmul.mubr.bf16.gmra.mxu1 %v593_v34 }
  0x53   :  { %353 = vmatprep.mubr.bf16.mxu0 %v689_v0  ;;  %426 = vmatprep.mubr.bf16.mxu1 %v689_v0 }
  0x5a   :  { %354 = vmatmul.mubr.bf16.gmra.mxu0 %v594_v35  ;;  %427 = vmatmul.mubr.bf16.gmra.mxu1 %v594_v35 }
  0x5b   :  { %363 = vmatprep.mubr.bf16.mxu0 %v689_v0  ;;  %436 = vmatprep.mubr.bf16.mxu1 %v689_v0 }
  0x62   :  { %364 = vmatmul.mubr.bf16.gmra.mxu0 %v595_v36  ;;  %437 = vmatmul.mubr.bf16.gmra.mxu1 %v595_v36 }
 0x10a   :  { %v335_v48 = vpop.f32.mrf.mxu0  ;;  %v408_v49 = vpop.f32.mrf.mxu1 }
 0x10b   :  { %v336_v50 = vadd.f32 %v335_v48, %v730_v44  ;;  %v409_v51 = vadd.f32 %v408_v49, %v732_v45 }
 0x10c   :  { %v337_v52 = vpop.f32.mrf.mxu0  ;;  %v410_v53 = vpop.f32.mrf.mxu1 }
 0x10d   :  { %447 = vst [vmem:[#allocation8] sm:$0xff] %v336_v50  ;;  %449 = vst [vmem:[#allocation8 + $0x10] sm:$0xff] %v409_v51  ;;  %v338_v54 = vadd.f32 %v337_v52, %v734_v46  ;;  %v411_v55 = vadd.f32 %v410_v53, %v736_v47 }
 0x10e   :  { %v339_v56 = vpop.f32.mrf.mxu0  ;;  %v412_v57 = vpop.f32.mrf.mxu1 }
 0x10f   :  { %448 = vst [vmem:[#allocation8 + $0x8] sm:$0xff] %v338_v54  ;;  %450 = vst [vmem:[#allocation8 + $0x18] sm:$0xff] %v411_v55  ;;  %v340_v58 = vadd.f32 %v339_v56, %v730_v44  ;;  %v413_v59 = vadd.f32 %v412_v57, %v732_v45 }
 0x110   :  { %v341_v60 = vpop.f32.mrf.mxu0  ;;  %v414_v61 = vpop.f32.mrf.mxu1 }
 0x111   :  { %451 = vst [vmem:[#allocation8 + $0x20] sm:$0xff] %v340_v58  ;;  %453 = vst [vmem:[#allocation8 + $0x30] sm:$0xff] %v413_v59  ;;  %v342_v62 = vadd.f32 %v341_v60, %v734_v46  ;;  %v415_v63 = vadd.f32 %v414_v61, %v736_v47 }
 0x112   :  { %v345_v0 = vpop.f32.mrf.mxu0  ;;  %v418_v1 = vpop.f32.mrf.mxu1 }
 0x113   :  { %452 = vst [vmem:[#allocation8 + $0x28] sm:$0xff] %v342_v62  ;;  %454 = vst [vmem:[#allocation8 + $0x38] sm:$0xff] %v415_v63  ;;  %v346_v2 = vadd.f32 %v345_v0, %v730_v44  ;;  %v419_v3 = vadd.f32 %v418_v1, %v732_v45 }
 0x114   :  { %v347_v4 = vpop.f32.mrf.mxu0  ;;  %v420_v5 = vpop.f32.mrf.mxu1 }
 0x115   :  { %455 = vst [vmem:[#allocation8 + $0x40] sm:$0xff] %v346_v2  ;;  %457 = vst [vmem:[#allocation8 + $0x50] sm:$0xff] %v419_v3  ;;  %v348_v6 = vadd.f32 %v347_v4, %v734_v46  ;;  %v421_v7 = vadd.f32 %v420_v5, %v736_v47 }
 0x116   :  { %v349_v8 = vpop.f32.mrf.mxu0  ;;  %v422_v9 = vpop.f32.mrf.mxu1 }
 0x117   :  { %456 = vst [vmem:[#allocation8 + $0x48] sm:$0xff] %v348_v6  ;;  %458 = vst [vmem:[#allocation8 + $0x58] sm:$0xff] %v421_v7  ;;  %v350_v10 = vadd.f32 %v349_v8, %v730_v44  ;;  %v423_v11 = vadd.f32 %v422_v9, %v732_v45 }
 0x118   :  { %v351_v12 = vpop.f32.mrf.mxu0  ;;  %v424_v13 = vpop.f32.mrf.mxu1 }
 0x119   :  { %459 = vst [vmem:[#allocation8 + $0x60] sm:$0xff] %v350_v10  ;;  %461 = vst [vmem:[#allocation8 + $0x70] sm:$0xff] %v423_v11  ;;  %v352_v14 = vadd.f32 %v351_v12, %v734_v46  ;;  %v425_v15 = vadd.f32 %v424_v13, %v736_v47 }
 0x11a   :  { %v355_v16 = vpop.f32.mrf.mxu0  ;;  %v428_v17 = vpop.f32.mrf.mxu1 }
 0x11b   :  { %460 = vst [vmem:[#allocation8 + $0x68] sm:$0xff] %v352_v14  ;;  %462 = vst [vmem:[#allocation8 + $0x78] sm:$0xff] %v425_v15  ;;  %v356_v18 = vadd.f32 %v355_v16, %v730_v44  ;;  %v429_v19 = vadd.f32 %v428_v17, %v732_v45 }
 0x11c   :  { %v357_v20 = vpop.f32.mrf.mxu0  ;;  %v430_v21 = vpop.f32.mrf.mxu1 }
 0x11d   :  { %463 = vst [vmem:[#allocation8 + $0x80] sm:$0xff] %v356_v18  ;;  %465 = vst [vmem:[#allocation8 + $0x90] sm:$0xff] %v429_v19  ;;  %v358_v22 = vadd.f32 %v357_v20, %v734_v46  ;;  %v431_v23 = vadd.f32 %v430_v21, %v736_v47 }
 0x11e   :  { %v359_v24 = vpop.f32.mrf.mxu0  ;;  %v432_v25 = vpop.f32.mrf.mxu1 }
 0x11f   :  { %464 = vst [vmem:[#allocation8 + $0x88] sm:$0xff] %v358_v22  ;;  %466 = vst [vmem:[#allocation8 + $0x98] sm:$0xff] %v431_v23  ;;  %v360_v26 = vadd.f32 %v359_v24, %v730_v44  ;;  %v433_v27 = vadd.f32 %v432_v25, %v732_v45 }
 0x120   :  { %v361_v28 = vpop.f32.mrf.mxu0  ;;  %v434_v29 = vpop.f32.mrf.mxu1 }
 0x121   :  { %467 = vst [vmem:[#allocation8 + $0xa0] sm:$0xff] %v360_v26  ;;  %469 = vst [vmem:[#allocation8 + $0xb0] sm:$0xff] %v433_v27  ;;  %v362_v30 = vadd.f32 %v361_v28, %v734_v46  ;;  %v435_v31 = vadd.f32 %v434_v29, %v736_v47 }
 0x122   :  { %v365_v32 = vpop.f32.mrf.mxu0  ;;  %v438_v33 = vpop.f32.mrf.mxu1 }
 0x123   :  { %468 = vst [vmem:[#allocation8 + $0xa8] sm:$0xff] %v362_v30  ;;  %470 = vst [vmem:[#allocation8 + $0xb8] sm:$0xff] %v435_v31  ;;  %v366_v34 = vadd.f32 %v365_v32, %v730_v44  ;;  %v439_v35 = vadd.f32 %v438_v33, %v732_v45 }
 0x124   :  { %v367_v36 = vpop.f32.mrf.mxu0  ;;  %v440_v37 = vpop.f32.mrf.mxu1 }
 0x125   :  { %471 = vst [vmem:[#allocation8 + $0xc0] sm:$0xff] %v366_v34  ;;  %473 = vst [vmem:[#allocation8 + $0xd0] sm:$0xff] %v439_v35  ;;  %v368_v38 = vadd.f32 %v367_v36, %v734_v46  ;;  %v441_v39 = vadd.f32 %v440_v37, %v736_v47 }
 0x126   :  { %v369_v40 = vpop.f32.mrf.mxu0  ;;  %v442_v41 = vpop.f32.mrf.mxu1 }
 0x127   :  { %472 = vst [vmem:[#allocation8 + $0xc8] sm:$0xff] %v368_v38  ;;  %474 = vst [vmem:[#allocation8 + $0xd8] sm:$0xff] %v441_v39  ;;  %v370_v42 = vadd.f32 %v369_v40, %v730_v44  ;;  %v443_v43 = vadd.f32 %v442_v41, %v732_v45 }
 0x128   :  { %v371_v48 = vpop.f32.mrf.mxu0  ;;  %v444_v49 = vpop.f32.mrf.mxu1 }
 0x129   :  { %475 = vst [vmem:[#allocation8 + $0xe0] sm:$0xff] %v370_v42  ;;  %477 = vst [vmem:[#allocation8 + $0xf0] sm:$0xff] %v443_v43  ;;  %v372_v50 = vadd.f32 %v371_v48, %v734_v46  ;;  %v445_v51 = vadd.f32 %v444_v49, %v736_v47 }
 0x12b   :  { %476 = vst [vmem:[#allocation8 + $0xe8] sm:$0xff] %v372_v50  ;;  %478 = vst [vmem:[#allocation8 + $0xf8] sm:$0xff] %v445_v51 }
 0x12c   :  { %667 = shalt.err (!%p664_p5)
}
 0x12d   :  { %s691_s4 = smov 512   ;;  %s692_s5 = smov 32  }
 0x12e   :  { %490 = dma.vmem_to_hbm [thread:$0]  %s485_s2, 4096, %s776_s3, [#allocation4], %s691_s4, %s691_s4, %s692_s5  }
 0x12f   :  { %680 = dma.done.wait [#allocation4], 4096  }
 0x130   :  { %681 = vsyncadd [#allocation4], 4294963200 }
 0x131   :  { %494 = vsyncpa [#allocation3], 1 }
 0x132   :  { %495 = vsyncpa [#allocation6], 1 }
 0x133   :  { %496 = vsyncpa [#allocation4], 1 }

</bundles_post_ra>
